<compile_context>
chip_gen: v5e
topology: v5e:2x2
jax: 0.10.0
libtpu: 0.0.40
codegen_flags: <defaults>
</compile_context>

<pallas_src>
import jax
import jax.numpy as jnp
from jax import lax
from jax.experimental import pallas as pl
from jax.experimental.pallas import tpu as pltpu

# ---------------- small synthetic config (lane-dense: hidden = 128) ----------------
SEQ = 8
HIDDEN = 128
NUM_HEADS = 4
NUM_KV_HEADS = 2
HEAD_DIM = 32
INTERMEDIATE = 256
RMS_EPS = 1e-6
ROPE_THETA = 10000.0

Q_SIZE = NUM_HEADS * HEAD_DIM        # 128
KV_SIZE = NUM_KV_HEADS * HEAD_DIM    # 64
GROUP = NUM_HEADS // NUM_KV_HEADS    # GQA group size
HALF = HEAD_DIM // 2
SCALE = HEAD_DIM ** -0.5


# ---------------- pallas_call plumbing ----------------
_CPARAMS = pltpu.CompilerParams(
    dimension_semantics=("arbitrary",),
    vmem_limit_bytes=32 * 1024 * 1024,
)


def _full_spec(shape):
    nd = len(shape)
    return pl.BlockSpec(shape, lambda *_, _nd=nd: (0,) * _nd)


# ---------------- fused decoder-layer kernel ----------------
def _decoder_layer_kernel(hidden_ref, resid_ref, cos_ref, sin_ref,
                          w_in_ln_ref, w_q_ref, w_k_ref, w_v_ref, w_o_ref,
                          w_post_ln_ref, w_gu_ref, w_down_ref,
                          hidden_out_ref, resid_out_ref):
    # ---- fused residual add + input RMSNorm (f32 VPU math) ----
    x = hidden_ref[...].astype(jnp.float32) + resid_ref[...].astype(jnp.float32)
    var = jnp.mean(x * x, axis=-1, keepdims=True)
    normed = (x * lax.rsqrt(var + RMS_EPS) * w_in_ln_ref[...]).astype(jnp.bfloat16)

    # ---- separate Q / K / V projections (bf16 MXU inputs, f32 accumulation).
    #      Each output slab is the full result of its own dot, so no slicing
    #      across a 128-lane tile boundary of a fused qkv result. ----
    q = jnp.dot(normed, w_q_ref[...], preferred_element_type=jnp.float32)   # [S, NH*D]
    k = jnp.dot(normed, w_k_ref[...], preferred_element_type=jnp.float32)   # [S, NKV*D]
    v = jnp.dot(normed, w_v_ref[...], preferred_element_type=jnp.float32)   # [S, NKV*D]

    # ---- gather heads into a leading batch dim (GQA expansion folded in) ----
    q_h = jnp.stack(
        [q[:, h * HEAD_DIM:(h + 1) * HEAD_DIM] for h in range(NUM_HEADS)], axis=0)
    k_h = jnp.stack(
        [k[:, (h // GROUP) * HEAD_DIM:(h // GROUP + 1) * HEAD_DIM]
         for h in range(NUM_HEADS)], axis=0)
    v_h = jnp.stack(
        [v[:, (h // GROUP) * HEAD_DIM:(h // GROUP + 1) * HEAD_DIM]
         for h in range(NUM_HEADS)], axis=0)                                # [NH, S, D]

    # ---- neox RoPE: rotate-half on the XLU (lane rotate via slice+concat) +
    #      sign flip on the VPU.  cos/sin are a single [S, D] table broadcast
    #      across heads — no MXU work, no rotation-matrix weight. ----
    cos = cos_ref[...][None]                                                # [1, S, D]
    sin = sin_ref[...][None]

    def _rope(t):
        rot = jnp.concatenate([-t[..., HALF:], t[..., :HALF]], axis=-1)
        return t * cos + rot * sin

    q_h = _rope(q_h)
    k_h = _rope(k_h)

    # ---- causal GQA attention, batched over heads (single dot_general each) ----
    s = lax.dot_general(q_h.astype(jnp.bfloat16), k_h.astype(jnp.bfloat16),
                        (((2,), (2,)), ((0,), (0,))),
                        preferred_element_type=jnp.float32) * SCALE        # [NH, S, S]
    ri = lax.broadcasted_iota(jnp.int32, (1, SEQ, SEQ), 1)
    ci = lax.broadcasted_iota(jnp.int32, (1, SEQ, SEQ), 2)
    s = jnp.where(ci <= ri, s, jnp.float32(-1e30))                          # f32 mask
    m = jnp.max(s, axis=-1, keepdims=True)
    p = jnp.exp(s - m)
    denom = jnp.sum(p, axis=-1, keepdims=True)
    p = p * pl.reciprocal(denom, approx=True)                               # EUP divide
    attn = lax.dot_general(p.astype(jnp.bfloat16), v_h.astype(jnp.bfloat16),
                           (((2,), (1,)), ((0,), (0,))),
                           preferred_element_type=jnp.float32)              # [NH, S, D]

    # ---- o_proj with head-major weights [NH, D, H]: batched dot + head sum ----
    attn_out = lax.dot_general(attn.astype(jnp.bfloat16), w_o_ref[...],
                               (((2,), (1,)), ((0,), (0,))),
                               preferred_element_type=jnp.float32)          # [NH, S, H]
    attn_out = jnp.sum(attn_out, axis=0)                                    # [S, H]

    # ---- fused residual add + post-attention RMSNorm ----
    resid2 = attn_out + x
    resid_out_ref[...] = resid2.astype(resid_out_ref.dtype)                 # f32 stream
    var2 = jnp.mean(resid2 * resid2, axis=-1, keepdims=True)
    normed2 = (resid2 * lax.rsqrt(var2 + RMS_EPS) * w_post_ln_ref[...]
               ).astype(jnp.bfloat16)

    # ---- gate_up proj -> SiLU * up -> down proj (split at 256: lane-aligned) ----
    gu = jnp.dot(normed2, w_gu_ref[...], preferred_element_type=jnp.float32)  # [S, 2I]
    gate = gu[:, :INTERMEDIATE]
    up = gu[:, INTERMEDIATE:]
    act = gate * jax.nn.sigmoid(gate) * up                                   # f32 VPU/EUP
    hidden_out_ref[...] = jnp.dot(act.astype(jnp.bfloat16), w_down_ref[...],
                                  preferred_element_type=jnp.float32
                                  ).astype(hidden_out_ref.dtype)             # bf16 out


# ---------------- host-side RoPE tables (one [S, head_dim] slab, not per-head) ----------------
def rope_tables(positions):
    inv_freq = 1.0 / (ROPE_THETA **
                      (jnp.arange(HALF, dtype=jnp.float32) * 2.0 / HEAD_DIM))
    freqs = positions.astype(jnp.float32)[:, None] * inv_freq[None, :]       # [S, half]
    cos = jnp.concatenate([jnp.cos(freqs), jnp.cos(freqs)], axis=-1)         # [S, D]
    sin = jnp.concatenate([jnp.sin(freqs), jnp.sin(freqs)], axis=-1)
    return cos, sin


# ---------------- decoder layer forward (1 pallas_call) ----------------
def llama_decoder_layer(positions, hidden_states, residual, params):
    cos, sin = rope_tables(positions)

    # residual is None on the first layer: adding zeros keeps one fused kernel
    # and is mathematically identical to "residual = hidden_states".
    if residual is None:
        residual = jnp.zeros(hidden_states.shape, jnp.float32)

    S, H = hidden_states.shape
    out_shapes = (jax.ShapeDtypeStruct((S, H), jnp.bfloat16),   # mlp output (hidden)
                  jax.ShapeDtypeStruct((S, H), jnp.float32))    # residual stream
    args = (hidden_states, residual, cos, sin,
            params["w_input_ln"], params["w_q"], params["w_k"], params["w_v"],
            params["w_o"], params["w_post_ln"], params["w_gate_up"],
            params["w_down"])
    return pl.pallas_call(
        _decoder_layer_kernel,
        grid=(1,),
        in_specs=[_full_spec(a.shape) for a in args],
        out_specs=[_full_spec(o.shape) for o in out_shapes],
        out_shape=out_shapes,
        compiler_params=_CPARAMS,
    )(*args)


# ---------------- deterministic parameter init ----------------
def init_params(key):
    ks = jax.random.split(key, 6)
    std = 0.02
    # activation-side weights stored as [in, out] so y = x @ W; o_proj stored
    # head-major [NH, D, H] so the kernel can batch over heads without a
    # lane-axis concatenate.  All matmul weights bf16 (MXU inputs).
    return {
        "w_q": (std * jax.random.normal(ks[0], (HIDDEN, Q_SIZE),
                                        jnp.float32)).astype(jnp.bfloat16),
        "w_k": (std * jax.random.normal(ks[1], (HIDDEN, KV_SIZE),
                                        jnp.float32)).astype(jnp.bfloat16),
        "w_v": (std * jax.random.normal(ks[2], (HIDDEN, KV_SIZE),
                                        jnp.float32)).astype(jnp.bfloat16),
        "w_o": (std * jax.random.normal(ks[3], (NUM_HEADS, HEAD_DIM, HIDDEN),
                                        jnp.float32)).astype(jnp.bfloat16),
        "w_gate_up": (std * jax.random.normal(ks[4], (HIDDEN, 2 * INTERMEDIATE),
                                              jnp.float32)).astype(jnp.bfloat16),
        "w_down": (std * jax.random.normal(ks[5], (INTERMEDIATE, HIDDEN),
                                           jnp.float32)).astype(jnp.bfloat16),
        # RMSNorm weights init to ones (as in the PyTorch module); kept 2-D + f32.
        "w_input_ln": jnp.ones((1, HIDDEN), jnp.float32),
        "w_post_ln": jnp.ones((1, HIDDEN), jnp.float32),
    }


# ---------------- pure-JAX reference (f32) for a sanity check ----------------
def reference_layer(positions, hidden, residual, params):
    def rms(x, w):
        var = jnp.mean(x * x, axis=-1, keepdims=True)
        return x * lax.rsqrt(var + RMS_EPS) * w

    if residual is None:
        residual = hidden
        normed = rms(hidden, params["w_input_ln"])
    else:
        residual = hidden + residual
        normed = rms(residual, params["w_input_ln"])

    S = hidden.shape[0]
    q = (normed @ params["w_q"].astype(jnp.float32)).reshape(S, NUM_HEADS, HEAD_DIM)
    k = (normed @ params["w_k"].astype(jnp.float32)).reshape(S, NUM_KV_HEADS, HEAD_DIM)
    v = (normed @ params["w_v"].astype(jnp.float32)).reshape(S, NUM_KV_HEADS, HEAD_DIM)

    inv_freq = 1.0 / (ROPE_THETA **
                      (jnp.arange(HALF, dtype=jnp.float32) * 2.0 / HEAD_DIM))
    freqs = positions.astype(jnp.float32)[:, None] * inv_freq[None, :]
    cos = jnp.concatenate([jnp.cos(freqs)] * 2, -1)[:, None, :]
    sin = jnp.concatenate([jnp.sin(freqs)] * 2, -1)[:, None, :]

    def rot(x):
        return jnp.concatenate([-x[..., HALF:], x[..., :HALF]], -1)

    q = q * cos + rot(q) * sin
    k = k * cos + rot(k) * sin
    k_full = jnp.repeat(k, GROUP, axis=1)
    v_full = jnp.repeat(v, GROUP, axis=1)
    s = jnp.einsum("qhd,khd->hqk", q, k_full) * SCALE
    mask = jnp.tril(jnp.ones((S, S), bool))
    s = jnp.where(mask[None], s, -1e30)
    p = jax.nn.softmax(s, axis=-1)
    attn = jnp.einsum("hqk,khd->qhd", p, v_full).reshape(S, Q_SIZE)
    w_o = params["w_o"].astype(jnp.float32).reshape(Q_SIZE, HIDDEN)
    attn_out = attn @ w_o

    residual2 = attn_out + residual
    normed2 = rms(residual2, params["w_post_ln"])
    gu = normed2 @ params["w_gate_up"].astype(jnp.float32)
    gate, up = gu[:, :INTERMEDIATE], gu[:, INTERMEDIATE:]
    act = gate * jax.nn.sigmoid(gate) * up
    out = act @ params["w_down"].astype(jnp.float32)
    return out, residual2


if __name__ == "__main__":
    key = jax.random.PRNGKey(0)
    pkey, xkey = jax.random.split(key)
    params = init_params(pkey)

    positions = jnp.arange(SEQ, dtype=jnp.int32)
    hidden_states = jax.random.normal(xkey, (SEQ, HIDDEN), jnp.float32)

    out, residual = llama_decoder_layer(positions, hidden_states, None, params)
    jax.block_until_ready((out, residual))

    assert out.shape == (SEQ, HIDDEN) and residual.shape == (SEQ, HIDDEN)
    assert out.dtype == jnp.bfloat16 and residual.dtype == jnp.float32
    out_f32 = out.astype(jnp.float32)
    assert jnp.all(jnp.isfinite(out_f32)) and jnp.all(jnp.isfinite(residual))

    out_ref, res_ref = reference_layer(positions, hidden_states, None, params)
    assert jnp.allclose(out_f32, out_ref, rtol=5e-2, atol=5e-2)
    assert jnp.allclose(residual, res_ref, rtol=5e-2, atol=5e-2)

    print("KERNEL_OK")
</pallas_src>

<mosaic_0001>
module attributes {stable_mosaic.version = 11 : i64} {
  func.func @_decoder_layer_kernel(%arg0: i32, %arg1: memref<8x128xf32, #tpu.memory_space<vmem>>, %arg2: memref<8x128xf32, #tpu.memory_space<vmem>>, %arg3: memref<8x32xf32, #tpu.memory_space<vmem>>, %arg4: memref<8x32xf32, #tpu.memory_space<vmem>>, %arg5: memref<1x128xf32, #tpu.memory_space<vmem>>, %arg6: memref<128x128xbf16, #tpu.memory_space<vmem>>, %arg7: memref<128x64xbf16, #tpu.memory_space<vmem>>, %arg8: memref<128x64xbf16, #tpu.memory_space<vmem>>, %arg9: memref<4x32x128xbf16, #tpu.memory_space<vmem>>, %arg10: memref<1x128xf32, #tpu.memory_space<vmem>>, %arg11: memref<128x512xbf16, #tpu.memory_space<vmem>>, %arg12: memref<256x128xbf16, #tpu.memory_space<vmem>>, %arg13: memref<8x128xbf16, #tpu.memory_space<vmem>>, %arg14: memref<8x128xf32, #tpu.memory_space<vmem>>) attributes {dimension_semantics = [#tpu.dimension_semantics<arbitrary>], iteration_bounds = array<i64: 1>, scalar_prefetch = 0 : i64, scratch_operands = 0 : i64, tpu.core_type = #tpu.core_type<tc>, window_params = [{pipeline_mode = #tpu.pipeline_mode<synchronous>, transform_indices = @transform_0, window_bounds = array<i64: 8, 128>}, {pipeline_mode = #tpu.pipeline_mode<synchronous>, transform_indices = @transform_1, window_bounds = array<i64: 8, 128>}, {pipeline_mode = #tpu.pipeline_mode<synchronous>, transform_indices = @transform_2, window_bounds = array<i64: 8, 32>}, {pipeline_mode = #tpu.pipeline_mode<synchronous>, transform_indices = @transform_3, window_bounds = array<i64: 8, 32>}, {pipeline_mode = #tpu.pipeline_mode<synchronous>, transform_indices = @transform_4, window_bounds = array<i64: 1, 128>}, {pipeline_mode = #tpu.pipeline_mode<synchronous>, transform_indices = @transform_5, window_bounds = array<i64: 128, 128>}, {pipeline_mode = #tpu.pipeline_mode<synchronous>, transform_indices = @transform_6, window_bounds = array<i64: 128, 64>}, {pipeline_mode = #tpu.pipeline_mode<synchronous>, transform_indices = @transform_7, window_bounds = array<i64: 128, 64>}, {pipeline_mode = #tpu.pipeline_mode<synchronous>, transform_indices = @transform_8, window_bounds = array<i64: 4, 32, 128>}, {pipeline_mode = #tpu.pipeline_mode<synchronous>, transform_indices = @transform_9, window_bounds = array<i64: 1, 128>}, {pipeline_mode = #tpu.pipeline_mode<synchronous>, transform_indices = @transform_10, window_bounds = array<i64: 128, 512>}, {pipeline_mode = #tpu.pipeline_mode<synchronous>, transform_indices = @transform_11, window_bounds = array<i64: 256, 128>}, {pipeline_mode = #tpu.pipeline_mode<synchronous>, transform_indices = @transform_12, window_bounds = array<i64: 8, 128>}, {pipeline_mode = #tpu.pipeline_mode<synchronous>, transform_indices = @transform_13, window_bounds = array<i64: 8, 128>}]} {
    %c0 = arith.constant 0 : index
    %c0_0 = arith.constant 0 : index
    %0 = vector.load %arg1[%c0, %c0_0] : memref<8x128xf32, #tpu.memory_space<vmem>>, vector<8x128xf32>
    %c0_1 = arith.constant 0 : index
    %c0_2 = arith.constant 0 : index
    %1 = vector.load %arg2[%c0_1, %c0_2] : memref<8x128xf32, #tpu.memory_space<vmem>>, vector<8x128xf32>
    %2 = arith.addf %0, %1 : vector<8x128xf32>
    %3 = arith.mulf %2, %2 : vector<8x128xf32>
    %cst = arith.constant dense<0.000000e+00> : vector<8xf32>
    %4 = vector.multi_reduction <add>, %3, %cst [1] : vector<8x128xf32> to vector<8xf32>
    %5 = vector.shape_cast %4 : vector<8xf32> to vector<8x1xf32>
    %cst_3 = arith.constant 1.280000e+02 : f32
    %6 = vector.broadcast %cst_3 : f32 to vector<8x1xf32>
    %7 = arith.divf %5, %6 : vector<8x1xf32>
    %cst_4 = arith.constant 9.99999997E-7 : f32
    %8 = vector.broadcast %cst_4 : f32 to vector<8x1xf32>
    %9 = arith.addf %7, %8 : vector<8x1xf32>
    %10 = math.rsqrt %9 : vector<8x1xf32>
    %11 = vector.broadcast %10 : vector<8x1xf32> to vector<8x128xf32>
    %12 = arith.mulf %2, %11 : vector<8x128xf32>
    %c0_5 = arith.constant 0 : index
    %c0_6 = arith.constant 0 : index
    %13 = vector.load %arg5[%c0_5, %c0_6] : memref<1x128xf32, #tpu.memory_space<vmem>>, vector<1x128xf32>
    %14 = vector.broadcast %13 : vector<1x128xf32> to vector<8x128xf32>
    %15 = arith.mulf %12, %14 : vector<8x128xf32>
    %16 = arith.truncf %15 : vector<8x128xf32> to vector<8x128xbf16>
    %c0_7 = arith.constant 0 : index
    %c0_8 = arith.constant 0 : index
    %17 = vector.load %arg6[%c0_7, %c0_8] : memref<128x128xbf16, #tpu.memory_space<vmem>>, vector<128x128xbf16>
    %cst_9 = arith.constant dense<0.000000e+00> : vector<8x128xf32>
    %18 = tpu.matmul %16, %17, %cst_9 {dimension_numbers = #tpu.dot_dimension_numbers<[1], [0], [0], [1], [0, 0, 1, 1], [], []>} : vector<8x128xbf16>, vector<128x128xbf16>, vector<8x128xf32> -> vector<8x128xf32>
    %c0_10 = arith.constant 0 : index
    %c0_11 = arith.constant 0 : index
    %19 = vector.load %arg7[%c0_10, %c0_11] : memref<128x64xbf16, #tpu.memory_space<vmem>>, vector<128x64xbf16>
    %cst_12 = arith.constant dense<0.000000e+00> : vector<8x64xf32>
    %20 = tpu.matmul %16, %19, %cst_12 {dimension_numbers = #tpu.dot_dimension_numbers<[1], [0], [0], [1], [0, 0, 1, 1], [], []>} : vector<8x128xbf16>, vector<128x64xbf16>, vector<8x64xf32> -> vector<8x64xf32>
    %c0_13 = arith.constant 0 : index
    %c0_14 = arith.constant 0 : index
    %21 = vector.load %arg8[%c0_13, %c0_14] : memref<128x64xbf16, #tpu.memory_space<vmem>>, vector<128x64xbf16>
    %cst_15 = arith.constant dense<0.000000e+00> : vector<8x64xf32>
    %22 = tpu.matmul %16, %21, %cst_15 {dimension_numbers = #tpu.dot_dimension_numbers<[1], [0], [0], [1], [0, 0, 1, 1], [], []>} : vector<8x128xbf16>, vector<128x64xbf16>, vector<8x64xf32> -> vector<8x64xf32>
    %23 = vector.extract_strided_slice %18 {offsets = [0, 0], sizes = [8, 32], strides = [1, 1]} : vector<8x128xf32> to vector<8x32xf32>
    %24 = vector.extract_strided_slice %18 {offsets = [0, 32], sizes = [8, 32], strides = [1, 1]} : vector<8x128xf32> to vector<8x32xf32>
    %25 = vector.extract_strided_slice %18 {offsets = [0, 64], sizes = [8, 32], strides = [1, 1]} : vector<8x128xf32> to vector<8x32xf32>
    %26 = vector.extract_strided_slice %18 {offsets = [0, 96], sizes = [8, 32], strides = [1, 1]} : vector<8x128xf32> to vector<8x32xf32>
    %27 = vector.shape_cast %23 : vector<8x32xf32> to vector<1x8x32xf32>
    %28 = vector.shape_cast %24 : vector<8x32xf32> to vector<1x8x32xf32>
    %29 = vector.shape_cast %25 : vector<8x32xf32> to vector<1x8x32xf32>
    %30 = vector.shape_cast %26 : vector<8x32xf32> to vector<1x8x32xf32>
    %31 = tpu.concatenate %27, %28, %29, %30 in 0 : vector<1x8x32xf32>, vector<1x8x32xf32>, vector<1x8x32xf32>, vector<1x8x32xf32> -> vector<4x8x32xf32>
    %32 = vector.extract_strided_slice %20 {offsets = [0, 0], sizes = [8, 32], strides = [1, 1]} : vector<8x64xf32> to vector<8x32xf32>
    %33 = vector.extract_strided_slice %20 {offsets = [0, 0], sizes = [8, 32], strides = [1, 1]} : vector<8x64xf32> to vector<8x32xf32>
    %34 = vector.extract_strided_slice %20 {offsets = [0, 32], sizes = [8, 32], strides = [1, 1]} : vector<8x64xf32> to vector<8x32xf32>
    %35 = vector.extract_strided_slice %20 {offsets = [0, 32], sizes = [8, 32], strides = [1, 1]} : vector<8x64xf32> to vector<8x32xf32>
    %36 = vector.shape_cast %32 : vector<8x32xf32> to vector<1x8x32xf32>
    %37 = vector.shape_cast %33 : vector<8x32xf32> to vector<1x8x32xf32>
    %38 = vector.shape_cast %34 : vector<8x32xf32> to vector<1x8x32xf32>
    %39 = vector.shape_cast %35 : vector<8x32xf32> to vector<1x8x32xf32>
    %40 = tpu.concatenate %36, %37, %38, %39 in 0 : vector<1x8x32xf32>, vector<1x8x32xf32>, vector<1x8x32xf32>, vector<1x8x32xf32> -> vector<4x8x32xf32>
    %41 = vector.extract_strided_slice %22 {offsets = [0, 0], sizes = [8, 32], strides = [1, 1]} : vector<8x64xf32> to vector<8x32xf32>
    %42 = vector.extract_strided_slice %22 {offsets = [0, 0], sizes = [8, 32], strides = [1, 1]} : vector<8x64xf32> to vector<8x32xf32>
    %43 = vector.extract_strided_slice %22 {offsets = [0, 32], sizes = [8, 32], strides = [1, 1]} : vector<8x64xf32> to vector<8x32xf32>
    %44 = vector.extract_strided_slice %22 {offsets = [0, 32], sizes = [8, 32], strides = [1, 1]} : vector<8x64xf32> to vector<8x32xf32>
    %45 = vector.shape_cast %41 : vector<8x32xf32> to vector<1x8x32xf32>
    %46 = vector.shape_cast %42 : vector<8x32xf32> to vector<1x8x32xf32>
    %47 = vector.shape_cast %43 : vector<8x32xf32> to vector<1x8x32xf32>
    %48 = vector.shape_cast %44 : vector<8x32xf32> to vector<1x8x32xf32>
    %49 = tpu.concatenate %45, %46, %47, %48 in 0 : vector<1x8x32xf32>, vector<1x8x32xf32>, vector<1x8x32xf32>, vector<1x8x32xf32> -> vector<4x8x32xf32>
    %c0_16 = arith.constant 0 : index
    %c0_17 = arith.constant 0 : index
    %50 = vector.load %arg3[%c0_16, %c0_17] : memref<8x32xf32, #tpu.memory_space<vmem>>, vector<8x32xf32>
    %51 = vector.shape_cast %50 : vector<8x32xf32> to vector<1x8x32xf32>
    %c0_18 = arith.constant 0 : index
    %c0_19 = arith.constant 0 : index
    %52 = vector.load %arg4[%c0_18, %c0_19] : memref<8x32xf32, #tpu.memory_space<vmem>>, vector<8x32xf32>
    %53 = vector.shape_cast %52 : vector<8x32xf32> to vector<1x8x32xf32>
    %54 = vector.extract_strided_slice %31 {offsets = [0, 0, 16], sizes = [4, 8, 16], strides = [1, 1, 1]} : vector<4x8x32xf32> to vector<4x8x16xf32>
    %cst_20 = arith.constant 0.000000e+00 : f32
    %55 = vector.broadcast %cst_20 : f32 to vector<4x8x16xf32>
    %56 = arith.subf %55, %54 : vector<4x8x16xf32>
    %57 = vector.extract_strided_slice %31 {offsets = [0, 0, 0], sizes = [4, 8, 16], strides = [1, 1, 1]} : vector<4x8x32xf32> to vector<4x8x16xf32>
    %58 = tpu.concatenate %56, %57 in 2 : vector<4x8x16xf32>, vector<4x8x16xf32> -> vector<4x8x32xf32>
    %59 = vector.broadcast %51 : vector<1x8x32xf32> to vector<4x8x32xf32>
    %60 = arith.mulf %31, %59 : vector<4x8x32xf32>
    %61 = vector.broadcast %53 : vector<1x8x32xf32> to vector<4x8x32xf32>
    %62 = arith.mulf %58, %61 : vector<4x8x32xf32>
    %63 = arith.addf %60, %62 : vector<4x8x32xf32>
    %64 = vector.extract_strided_slice %40 {offsets = [0, 0, 16], sizes = [4, 8, 16], strides = [1, 1, 1]} : vector<4x8x32xf32> to vector<4x8x16xf32>
    %cst_21 = arith.constant 0.000000e+00 : f32
    %65 = vector.broadcast %cst_21 : f32 to vector<4x8x16xf32>
    %66 = arith.subf %65, %64 : vector<4x8x16xf32>
    %67 = vector.extract_strided_slice %40 {offsets = [0, 0, 0], sizes = [4, 8, 16], strides = [1, 1, 1]} : vector<4x8x32xf32> to vector<4x8x16xf32>
    %68 = tpu.concatenate %66, %67 in 2 : vector<4x8x16xf32>, vector<4x8x16xf32> -> vector<4x8x32xf32>
    %69 = vector.broadcast %51 : vector<1x8x32xf32> to vector<4x8x32xf32>
    %70 = arith.mulf %40, %69 : vector<4x8x32xf32>
    %71 = vector.broadcast %53 : vector<1x8x32xf32> to vector<4x8x32xf32>
    %72 = arith.mulf %68, %71 : vector<4x8x32xf32>
    %73 = arith.addf %70, %72 : vector<4x8x32xf32>
    %74 = arith.truncf %63 : vector<4x8x32xf32> to vector<4x8x32xbf16>
    %75 = arith.truncf %73 : vector<4x8x32xf32> to vector<4x8x32xbf16>
    %cst_22 = arith.constant dense<0.000000e+00> : vector<4x8x8xf32>
    %76 = tpu.matmul %74, %75, %cst_22 {dimension_numbers = #tpu.dot_dimension_numbers<[2], [2], [1], [1], [0, 0, 0, 1, 1, 1], [0], [0]>} : vector<4x8x32xbf16>, vector<4x8x32xbf16>, vector<4x8x8xf32> -> vector<4x8x8xf32>
    %cst_23 = arith.constant 0.176776692 : f32
    %77 = vector.broadcast %cst_23 : f32 to vector<4x8x8xf32>
    %78 = arith.mulf %76, %77 : vector<4x8x8xf32>
    %79 = tpu.iota {dimensions = array<i32: 1>} : vector<1x8x8xi32>
    %80 = tpu.iota {dimensions = array<i32: 2>} : vector<1x8x8xi32>
    %81 = arith.cmpi sle, %80, %79 : vector<1x8x8xi32>
    %cst_24 = arith.constant -1.000000e+30 : f32
    %82 = vector.shape_cast %81 : vector<1x8x8xi1> to vector<1x8x8xi1>
    %83 = vector.broadcast %82 : vector<1x8x8xi1> to vector<4x8x8xi1>
    %84 = vector.broadcast %cst_24 : f32 to vector<4x8x8xf32>
    %85 = arith.select %83, %78, %84 : vector<4x8x8xi1>, vector<4x8x8xf32>
    %cst_25 = arith.constant dense<0xFF800000> : vector<4x8xf32>
    %86 = vector.multi_reduction <maximumf>, %85, %cst_25 [2] : vector<4x8x8xf32> to vector<4x8xf32>
    %87 = vector.shape_cast %86 : vector<4x8xf32> to vector<4x8x1xf32>
    %88 = vector.broadcast %87 : vector<4x8x1xf32> to vector<4x8x8xf32>
    %89 = arith.subf %85, %88 : vector<4x8x8xf32>
    %90 = math.exp %89 : vector<4x8x8xf32>
    %cst_26 = arith.constant dense<0.000000e+00> : vector<4x8xf32>
    %91 = vector.multi_reduction <add>, %90, %cst_26 [2] : vector<4x8x8xf32> to vector<4x8xf32>
    %92 = vector.shape_cast %91 : vector<4x8xf32> to vector<4x8x1xf32>
    %93 = tpu.reciprocal %92 {approx = true} : vector<4x8x1xf32> -> vector<4x8x1xf32>
    %94 = vector.broadcast %93 : vector<4x8x1xf32> to vector<4x8x8xf32>
    %95 = arith.mulf %90, %94 : vector<4x8x8xf32>
    %96 = arith.truncf %95 : vector<4x8x8xf32> to vector<4x8x8xbf16>
    %97 = arith.truncf %49 : vector<4x8x32xf32> to vector<4x8x32xbf16>
    %cst_27 = arith.constant dense<0.000000e+00> : vector<4x8x32xf32>
    %98 = tpu.matmul %96, %97, %cst_27 {dimension_numbers = #tpu.dot_dimension_numbers<[2], [1], [1], [2], [0, 0, 0, 1, 1, 2], [0], [0]>} : vector<4x8x8xbf16>, vector<4x8x32xbf16>, vector<4x8x32xf32> -> vector<4x8x32xf32>
    %99 = arith.truncf %98 : vector<4x8x32xf32> to vector<4x8x32xbf16>
    %c0_28 = arith.constant 0 : index
    %c0_29 = arith.constant 0 : index
    %c0_30 = arith.constant 0 : index
    %100 = vector.load %arg9[%c0_28, %c0_29, %c0_30] : memref<4x32x128xbf16, #tpu.memory_space<vmem>>, vector<4x32x128xbf16>
    %cst_31 = arith.constant dense<0.000000e+00> : vector<4x8x128xf32>
    %101 = tpu.matmul %99, %100, %cst_31 {dimension_numbers = #tpu.dot_dimension_numbers<[2], [1], [1], [2], [0, 0, 0, 1, 1, 2], [0], [0]>} : vector<4x8x32xbf16>, vector<4x32x128xbf16>, vector<4x8x128xf32> -> vector<4x8x128xf32>
    %cst_32 = arith.constant dense<0.000000e+00> : vector<8x128xf32>
    %102 = vector.multi_reduction <add>, %101, %cst_32 [0] : vector<4x8x128xf32> to vector<8x128xf32>
    %103 = arith.addf %102, %2 : vector<8x128xf32>
    %c0_33 = arith.constant 0 : index
    %c0_34 = arith.constant 0 : index
    %104 = vector.load %arg14[%c0_33, %c0_34] : memref<8x128xf32, #tpu.memory_space<vmem>>, vector<8x128xf32>
    tpu.vector_store %arg14[%c0_33, %c0_34], %103 {strides = array<i32>} : memref<8x128xf32, #tpu.memory_space<vmem>>, vector<8x128xf32>,
    %105 = arith.mulf %103, %103 : vector<8x128xf32>
    %cst_35 = arith.constant dense<0.000000e+00> : vector<8xf32>
    %106 = vector.multi_reduction <add>, %105, %cst_35 [1] : vector<8x128xf32> to vector<8xf32>
    %107 = vector.shape_cast %106 : vector<8xf32> to vector<8x1xf32>
    %cst_36 = arith.constant 1.280000e+02 : f32
    %108 = vector.broadcast %cst_36 : f32 to vector<8x1xf32>
    %109 = arith.divf %107, %108 : vector<8x1xf32>
    %cst_37 = arith.constant 9.99999997E-7 : f32
    %110 = vector.broadcast %cst_37 : f32 to vector<8x1xf32>
    %111 = arith.addf %109, %110 : vector<8x1xf32>
    %112 = math.rsqrt %111 : vector<8x1xf32>
    %113 = vector.broadcast %112 : vector<8x1xf32> to vector<8x128xf32>
    %114 = arith.mulf %103, %113 : vector<8x128xf32>
    %c0_38 = arith.constant 0 : index
    %c0_39 = arith.constant 0 : index
    %115 = vector.load %arg10[%c0_38, %c0_39] : memref<1x128xf32, #tpu.memory_space<vmem>>, vector<1x128xf32>
    %116 = vector.broadcast %115 : vector<1x128xf32> to vector<8x128xf32>
    %117 = arith.mulf %114, %116 : vector<8x128xf32>
    %118 = arith.truncf %117 : vector<8x128xf32> to vector<8x128xbf16>
    %c0_40 = arith.constant 0 : index
    %c0_41 = arith.constant 0 : index
    %119 = vector.load %arg11[%c0_40, %c0_41] : memref<128x512xbf16, #tpu.memory_space<vmem>>, vector<128x512xbf16>
    %cst_42 = arith.constant dense<0.000000e+00> : vector<8x512xf32>
    %120 = tpu.matmul %118, %119, %cst_42 {dimension_numbers = #tpu.dot_dimension_numbers<[1], [0], [0], [1], [0, 0, 1, 1], [], []>} : vector<8x128xbf16>, vector<128x512xbf16>, vector<8x512xf32> -> vector<8x512xf32>
    %121 = vector.extract_strided_slice %120 {offsets = [0, 0], sizes = [8, 256], strides = [1, 1]} : vector<8x512xf32> to vector<8x256xf32>
    %122 = vector.extract_strided_slice %120 {offsets = [0, 256], sizes = [8, 256], strides = [1, 1]} : vector<8x512xf32> to vector<8x256xf32>
    %123 = arith.negf %121 : vector<8x256xf32>
    %124 = math.exp %123 : vector<8x256xf32>
    %cst_43 = arith.constant 1.000000e+00 : f32
    %125 = vector.broadcast %cst_43 : f32 to vector<8x256xf32>
    %126 = arith.addf %125, %124 : vector<8x256xf32>
    %127 = arith.divf %125, %126 : vector<8x256xf32>
    %128 = arith.mulf %121, %127 : vector<8x256xf32>
    %129 = arith.mulf %128, %122 : vector<8x256xf32>
    %130 = arith.truncf %129 : vector<8x256xf32> to vector<8x256xbf16>
    %c0_44 = arith.constant 0 : index
    %c0_45 = arith.constant 0 : index
    %131 = vector.load %arg12[%c0_44, %c0_45] : memref<256x128xbf16, #tpu.memory_space<vmem>>, vector<256x128xbf16>
    %cst_46 = arith.constant dense<0.000000e+00> : vector<8x128xf32>
    %132 = tpu.matmul %130, %131, %cst_46 {dimension_numbers = #tpu.dot_dimension_numbers<[1], [0], [0], [1], [0, 0, 1, 1], [], []>} : vector<8x256xbf16>, vector<256x128xbf16>, vector<8x128xf32> -> vector<8x128xf32>
    %133 = arith.truncf %132 : vector<8x128xf32> to vector<8x128xbf16>
    %c0_47 = arith.constant 0 : index
    %c0_48 = arith.constant 0 : index
    %134 = vector.load %arg13[%c0_47, %c0_48] : memref<8x128xbf16, #tpu.memory_space<vmem>>, vector<8x128xbf16>
    tpu.vector_store %arg13[%c0_47, %c0_48], %133 {strides = array<i32>} : memref<8x128xbf16, #tpu.memory_space<vmem>>, vector<8x128xbf16>,
    return
  }
  func.func @transform_0(%arg0: i32) -> (i32, i32) {
    %c0_i32 = arith.constant 0 : i32
    %c0_i32_0 = arith.constant 0 : i32
    %c0_i32_1 = arith.constant 0 : i32
    return %c0_i32, %c0_i32_0 : i32, i32
  }
  func.func @transform_1(%arg0: i32) -> (i32, i32) {
    %c0_i32 = arith.constant 0 : i32
    %c0_i32_0 = arith.constant 0 : i32
    %c0_i32_1 = arith.constant 0 : i32
    return %c0_i32, %c0_i32_0 : i32, i32
  }
  func.func @transform_2(%arg0: i32) -> (i32, i32) {
    %c0_i32 = arith.constant 0 : i32
    %c0_i32_0 = arith.constant 0 : i32
    %c0_i32_1 = arith.constant 0 : i32
    return %c0_i32, %c0_i32_0 : i32, i32
  }
  func.func @transform_3(%arg0: i32) -> (i32, i32) {
    %c0_i32 = arith.constant 0 : i32
    %c0_i32_0 = arith.constant 0 : i32
    %c0_i32_1 = arith.constant 0 : i32
    return %c0_i32, %c0_i32_0 : i32, i32
  }
  func.func @transform_4(%arg0: i32) -> (i32, i32) {
    %c0_i32 = arith.constant 0 : i32
    %c0_i32_0 = arith.constant 0 : i32
    %c0_i32_1 = arith.constant 0 : i32
    return %c0_i32, %c0_i32_0 : i32, i32
  }
  func.func @transform_5(%arg0: i32) -> (i32, i32) {
    %c0_i32 = arith.constant 0 : i32
    %c0_i32_0 = arith.constant 0 : i32
    %c0_i32_1 = arith.constant 0 : i32
    return %c0_i32, %c0_i32_0 : i32, i32
  }
  func.func @transform_6(%arg0: i32) -> (i32, i32) {
    %c0_i32 = arith.constant 0 : i32
    %c0_i32_0 = arith.constant 0 : i32
    %c0_i32_1 = arith.constant 0 : i32
    return %c0_i32, %c0_i32_0 : i32, i32
  }
  func.func @transform_7(%arg0: i32) -> (i32, i32) {
    %c0_i32 = arith.constant 0 : i32
    %c0_i32_0 = arith.constant 0 : i32
    %c0_i32_1 = arith.constant 0 : i32
    return %c0_i32, %c0_i32_0 : i32, i32
  }
  func.func @transform_8(%arg0: i32) -> (i32, i32, i32) {
    %c0_i32 = arith.constant 0 : i32
    %c0_i32_0 = arith.constant 0 : i32
    %c0_i32_1 = arith.constant 0 : i32
    %c0_i32_2 = arith.constant 0 : i32
    return %c0_i32, %c0_i32_0, %c0_i32_1 : i32, i32, i32
  }
  func.func @transform_9(%arg0: i32) -> (i32, i32) {
    %c0_i32 = arith.constant 0 : i32
    %c0_i32_0 = arith.constant 0 : i32
    %c0_i32_1 = arith.constant 0 : i32
    return %c0_i32, %c0_i32_0 : i32, i32
  }
  func.func @transform_10(%arg0: i32) -> (i32, i32) {
    %c0_i32 = arith.constant 0 : i32
    %c0_i32_0 = arith.constant 0 : i32
    %c0_i32_1 = arith.constant 0 : i32
    return %c0_i32, %c0_i32_0 : i32, i32
  }
  func.func @transform_11(%arg0: i32) -> (i32, i32) {
    %c0_i32 = arith.constant 0 : i32
    %c0_i32_0 = arith.constant 0 : i32
    %c0_i32_1 = arith.constant 0 : i32
    return %c0_i32, %c0_i32_0 : i32, i32
  }
  func.func @transform_12(%arg0: i32) -> (i32, i32) {
    %c0_i32 = arith.constant 0 : i32
    %c0_i32_0 = arith.constant 0 : i32
    %c0_i32_1 = arith.constant 0 : i32
    return %c0_i32, %c0_i32_0 : i32, i32
  }
  func.func @transform_13(%arg0: i32) -> (i32, i32) {
    %c0_i32 = arith.constant 0 : i32
    %c0_i32_0 = arith.constant 0 : i32
    %c0_i32_1 = arith.constant 0 : i32
    return %c0_i32, %c0_i32_0 : i32, i32
  }
}

</mosaic_0001>

<bundles_post_ra>
// kernel: tpu_custom_call.1
= control target key start
LH: loop header
LB: loop body
LE: loop exit
PB: predicated region body
PF: predicated region fallthrough
CT: control target
= control target key end

     0   :  { %19 = vsyncpa [#allocation3], 0  ;;  %s2195_s0 = inlined_call_operand.vmem [shape: f32[8,128], index: 0, kind: input, shape index: {}]   ;;  %s2196_s1 = inlined_call_operand.vmem [shape: f32[8,128], index: 1, kind: input, shape index: {}]   ;;  %s2197_s2 = inlined_call_operand.vmem [shape: f32[8,32], index: 2, kind: input, shape index: {}]   ;;  %s2198_s3 = inlined_call_operand.vmem [shape: f32[8,32], index: 3, kind: input, shape index: {}]   ;;  %s2199_s4 = inlined_call_operand.vmem [shape: f32[1,128], index: 4, kind: input, shape index: {}]   ;;  %s2200_s5 = inlined_call_operand.hbm [shape: bf16[128,128], index: 5, kind: input, shape index: {}]   ;;  %s2201_s6 = inlined_call_operand.vmem [shape: bf16[128,64], index: 6, kind: input, shape index: {}]   ;;  %s2202_s7 = inlined_call_operand.vmem [shape: bf16[128,64], index: 7, kind: input, shape index: {}]   ;;  %s2203_s8 = inlined_call_operand.hbm [shape: bf16[4,32,128], index: 8, kind: input, shape index: {}]   ;;  %s2204_s9 = inlined_call_operand.vmem [shape: f32[1,128], index: 9, kind: input, shape index: {}]   ;;  %s2205_s10 = inlined_call_operand.hbm [shape: bf16[128,512], index: 10, kind: input, shape index: {}]   ;;  %s2206_s11 = inlined_call_operand.vmem [shape: bf16[256,128], index: 11, kind: input, shape index: {}]   ;;  %s2207_s12 = inlined_call_operand.hbm [shape: bf16[8,128], index: 12, kind: output, shape index: {0}]   ;;  %s2208_s13 = inlined_call_operand.hbm [shape: f32[8,128], index: 13, kind: output, shape index: {1}]  }
   0x1   :  { %20 = vsyncpa [#allocation6], 0 }
   0x2   :  { %21 = vsyncpa [#allocation4], 0 }
   0x3   :  { %22 = vsyncpa [#allocation10], 0  ;;  %s54_s27 = sshll.u32 %s2203_s8, 4  ;;  %s1887_s28 = smov [#allocation5]   ;;  %s55_s27 = int_to_ptr.hbm [resolvable:$true] %s54_s27 }
   0x4   :  { %s56_s29 = sshll.u32 %s1887_s28, 4  ;;  %s37_s15 = sshll.u32 %s2200_s5, 4  ;;  %s57_s29 = int_to_ptr.vmem [resolvable:$true] %s56_s29  ;;  %s38_s15 = int_to_ptr.hbm [resolvable:$true] %s37_s15 }
   0x5   :  { %s1888_s16 = smov 64   ;;  %s1889_s17 = smov 4  }
   0x6   :  { %62 = dma.hbm_to_vmem [thread:$0]  %s55_s27, 1024, %s57_s29, [#allocation6], %s1888_s16, %s1888_s16, %s1889_s17  }
   0x7   :  { %s1890_s18 = smov [#allocation2]   ;;  %s69_s8 = sshll.u32 %s2205_s10, 4  ;;  %s70_s8 = int_to_ptr.hbm [resolvable:$true] %s69_s8 }
   0x8   :  { %s39_s19 = sshll.u32 %s1890_s18, 4  ;;  %s1891_s22 = smov [#allocation7]   ;;  %s40_s19 = int_to_ptr.vmem [resolvable:$true] %s39_s19 }
   0x9   :  { %45 = dma.hbm_to_vmem [thread:$0]  %s38_s15, 1024, %s40_s19, [#allocation3], %s1888_s16, %s1888_s16, %s1889_s17  }
   0xa   :  { %s71_s23 = sshll.u32 %s1891_s22, 4  ;;  %s1892_s5 = smov 256   ;;  %s72_s23 = int_to_ptr.vmem [resolvable:$true] %s71_s23 }
   0xb   :  { %s1893_s24 = smov 16  }
   0xc   :  { %77 = dma.hbm_to_vmem [thread:$0]  %s70_s8, 4096, %s72_s23, [#allocation6], %s1892_s5, %s1892_s5, %s1893_s24  }
   0xd   :  { %1879 = dma.done.wait [#allocation3], 1024  }
   0xe   :  { %1880 = vsyncadd [#allocation3], 4294966272 }
   0xf   :  { %1881 = dma.done.wait [#allocation6], 5120  }
  0x10   :  { %1882 = vsyncadd [#allocation6], 4294962176  ;;  %v93_v0 = vld [vmem:[%s2195_s0] sm:$0xff]  ;;  %v1641_v2 = vld [vmem:[#allocation2 + $0x38] sm:$0xff]  ;;  %v1894_v13 = vmov 128.0   ;;  %s1895_s8 = smov 96  }
  0x11   :  { %v94_v1 = vld [vmem:[%s2196_s1] sm:$0xff]  ;;  %v1649_v4 = vld [vmem:[%s2201_s6 + $0x38] sm:$0xff]  ;;  %189 = vmatpush.bf16.msra.mxu0 %v1641_v2  ;;  %v1640_v7 = vld [vmem:[#allocation2 + $0x30] sm:$0xff]  ;;  %1729 = vrcp.f32 %v1894_v13  ;;  %vm595_vm4 = vcmask 1043456   ;;  %s1897_s22 = smov 32   ;;  %vm408_vm5 = vcmask 130048  }
  0x12   :  { %v1990_v3 = vadd.f32 %v94_v1, %v93_v0  ;;  %v1657_v5 = vld [vmem:[%s2202_s7 + $0x38] sm:$0xff]  ;;  %266 = vmatpush.bf16.msra.mxu1 %v1649_v4  ;;  %v1648_v8 = vld [vmem:[%s2201_s6 + $0x30] sm:$0xff]  ;;  %v1639_v10 = vld [vmem:[#allocation2 + $0x28] sm:$0xff]  ;;  %vm455_vm6 = vcmask 261120   ;;  %vm541_vm8 = vcmask 64512   ;;  %s1284_s30 = sshll.u32 %s2208_s13, 4  ;;  %s1285_s30 = int_to_ptr.hbm [resolvable:$true] %s1284_s30 }
  0x13   :  { %343 = vmatpush.bf16.msra.mxu2 %v1657_v5  ;;  %v1656_v9 = vld [vmem:[%s2202_s7 + $0x30] sm:$0xff]  ;;  %v1647_v11 = vld [vmem:[%s2201_s6 + $0x28] sm:$0xff]  ;;  %v1638_v14 = vld [vmem:[#allocation2 + $0x20] sm:$0xff]  ;;  %s1899_s14 = smov [#allocation8]   ;;  %s1273_s17 = sshll.u32 %s2207_s12, 4  ;;  %s1274_s17 = int_to_ptr.hbm [resolvable:$true] %s1273_s17 }
  0x14   :  { %v96_v6 = vmul.f32 %v1990_v3, %v1990_v3  ;;  %v1655_v12 = vld [vmem:[%s2202_s7 + $0x28] sm:$0xff]  ;;  %v1646_v15 = vld [vmem:[%s2201_s6 + $0x20] sm:$0xff]  ;;  %v1637_v18 = vld [vmem:[#allocation2 + $0x18] sm:$0xff]  ;;  %s1271_s0 = sshll.u32 %s1899_s14, 4  ;;  %s1272_s0 = int_to_ptr.vmem [resolvable:$true] %s1271_s0 }
  0x15   :  { %190 = vmatpush.bf16.msra.mxu0 %v1640_v7  ;;  %v1654_v16 = vld [vmem:[%s2202_s7 + $0x20] sm:$0xff]  ;;  %v1645_v19 = vld [vmem:[%s2201_s6 + $0x18] sm:$0xff]  ;;  %v1636_v22 = vld [vmem:[#allocation2 + $0x10] sm:$0xff] }
  0x16   :  { %97 = vadd.xlane.f32.xlu0 %v96_v6  ;;  %267 = vmatpush.bf16.msra.mxu1 %v1648_v8  ;;  %v1653_v20 = vld [vmem:[%s2202_s7 + $0x18] sm:$0xff]  ;;  %v1644_v23 = vld [vmem:[%s2201_s6 + $0x10] sm:$0xff]  ;;  %v1635_v26 = vld [vmem:[#allocation2 + $0x8] sm:$0xff] }
  0x17   :  { %344 = vmatpush.bf16.msra.mxu2 %v1656_v9  ;;  %v1730_v17 = vpop.eup %1729  ;;  %v1652_v24 = vld [vmem:[%s2202_s7 + $0x10] sm:$0xff]  ;;  %v1643_v27 = vld [vmem:[%s2201_s6 + $0x8] sm:$0xff]  ;;  %v1634_v30 = vld [vmem:[#allocation2] sm:$0xff] }
  0x18   :  { %v100_v21 = vmul.f32 128.0, %v1730_v17  ;;  %v1651_v28 = vld [vmem:[%s2202_s7 + $0x8] sm:$0xff]  ;;  %v1642_v31 = vld [vmem:[%s2201_s6] sm:$0xff]  ;;  %vm104_vm0 = vweird.f32 %v1730_v17 }
  0x19   :  { %191 = vmatpush.bf16.msra.mxu0 %v1639_v10  ;;  %v1650_v32 = vld [vmem:[%s2202_s7] sm:$0xff] }
  0x1a   :  { %268 = vmatpush.bf16.msra.mxu1 %v1647_v11  ;;  %v101_v25 = vsub.f32 1.0, %v100_v21  ;;  %v1727_v44 = vld [vmem:[%s2199_s4] ss:$0 sm:$0xff]  ;;  %s1896_s4 = smov 112  }
  0x1b   :  { %345 = vmatpush.bf16.msra.mxu2 %v1655_v12  ;;  %v2067_v60 = vld [vmem:[%s2198_s3] sm:$0xff] }
  0x1c   :  { %v102_v29 = vmul.f32 %v1730_v17, %v101_v25  ;;  %v2072_v61 = vld [vmem:[%s2197_s2] sm:$0xff] }
  0x1d   :  { %192 = vmatpush.bf16.msra.mxu0 %v1638_v14 }
  0x1e   :  { %269 = vmatpush.bf16.msra.mxu1 %v1646_v15  ;;  %v103_v33 = vadd.f32 %v1730_v17, %v102_v29 }
  0x1f   :  { %346 = vmatpush.bf16.msra.mxu2 %v1654_v16 }
  0x20   :  { %v2042_v34 = vsel %vm104_vm0, %v1730_v17, %v103_v33 }
  0x21   :  { %193 = vmatpush.bf16.msra.mxu0 %v1637_v18 }
  0x22   :  { %270 = vmatpush.bf16.msra.mxu1 %v1645_v19 }
  0x23   :  { %347 = vmatpush.bf16.msra.mxu2 %v1653_v20 }
  0x25   :  { %194 = vmatpush.bf16.msra.mxu0 %v1636_v22 }
  0x26   :  { %271 = vmatpush.bf16.msra.mxu1 %v1644_v23 }
  0x27   :  { %348 = vmatpush.bf16.msra.mxu2 %v1652_v24 }
  0x29   :  { %195 = vmatpush.bf16.msra.mxu0 %v1635_v26 }
  0x2a   :  { %272 = vmatpush.bf16.msra.mxu1 %v1643_v27 }
  0x2b   :  { %349 = vmatpush.bf16.msra.mxu2 %v1651_v28 }
  0x2d   :  { %196 = vmatpush.bf16.msra.mxu0 %v1634_v30 }
  0x2e   :  { %273 = vmatpush.bf16.msra.mxu1 %v1642_v31 }
  0x2f   :  { %350 = vmatpush.bf16.msra.mxu2 %v1650_v32 }
  0x89   :  { %v98_v35 = vpop.xlane.xlu0 %97 }
  0x8a   :  { %v106_v36 = vmul.f32 %v2042_v34, %v98_v35 }
  0x8c   :  { %v107_v37 = vadd.f32 1e-06, %v106_v36 }
  0x8e   :  { %1731 = vrsqrt.f32 %v107_v37  ;;  %vm114_vm2 = vweird.f32 %v107_v37 }
  0x94   :  { %v1732_v38 = vpop.eup %1731 }
  0x95   :  { %v109_v39 = vmul.f32 %v1732_v38, %v107_v37  ;;  %vm115_vm1 = vweird.f32 %v1732_v38 }
  0x96   :  { %vm116_vm3 = vmor %vm114_vm2, %vm115_vm1 }
  0x97   :  { %v110_v40 = vmul.f32 %v1732_v38, %v109_v39 }
  0x99   :  { %v111_v41 = vmul.f32 0.5, %v110_v40 }
  0x9b   :  { %v112_v42 = vsub.f32 1.5, %v111_v41 }
  0x9d   :  { %v113_v43 = vmul.f32 %v1732_v38, %v112_v42 }
  0x9f   :  { %v117_v45 = vsel %vm116_vm3, %v1732_v38, %v113_v43 }
  0xa0   :  { %v118_v46 = vmul.f32 %v117_v45, %v1990_v3 }
  0xa2   :  { %v123_v47 = vmul.f32 %v1727_v44, %v118_v46 }
  0xa4   :  { %v124_v48 = vpack.c.bf16 %v123_v47, %v123_v47 }
  0xa6   :  { %197 = vmatmul.bf16.vlgmr.msra.gmra.mxu0 %v124_v48  ;;  %274 = vmatmul.bf16.vlgmr.msra.gmra.mxu1 %v124_v48 }
  0xa7   :  { %351 = vmatmul.bf16.vlgmr.msra.gmra.mxu2 %v124_v48 }
 0x123   :  { %v198_v49 = vpop.f32.mrf.mxu0  ;;  %v275_v50 = vpop.f32.mrf.mxu1 }
 0x124   :  { %435 = vrot.lane.b32.xlu2 %v275_v50, %s1893_s24  ;;  %367 = vrot.lane.b32.xlu1 %v275_v50, %s1895_s8  ;;  %v425_v52 = vsub.f32 0.0, %v275_v50  ;;  %v376_v58 = vsub.f32 0.0, %v198_v49  ;;  %v443_v1 = vmul.f32 %v2072_v61, %v275_v50  ;;  %v413_v16 = vmul.f32 %v2072_v61, %v198_v49 }
 0x125   :  { %357 = vrot.lane.b32.xlu0 %v198_v49, %s1895_s8 }
 0x12a   :  { %v2052_v51 = vpop.f32.mrf.mxu2 }
 0x12b   :  { %v590_v53 = vpack.c.bf16 %v2052_v51, %v2052_v51  ;;  %v200_v54 = vpop.f32.mrf.mxu0  ;;  %v277_v55 = vpop.f32.mrf.mxu1 }
 0x12c   :  { %429 = vrot.lane.b32.xlu2 %v425_v52, %s1896_s4  ;;  %360 = vrot.lane.b32.xlu1 %v198_v49, %s1888_s16  ;;  %v530_v52 = vlaneseq }
 0x12d   :  { %v2059_v56 = vsel %vm595_vm4, %v590_v53, 0 }
 0x12e   :  { %622 = vmatpush.bf16.msrb.mxu2 %v2059_v56  ;;  %v531_v53 = vshrl.u32 %v530_v52, 7  ;;  %v533_v54 = vand.u32 127, %v530_v52 }
 0x130   :  { %vm534_vm7 = vcmp.le.s32.totalorder %v533_v54, %v531_v53 }
 0x132   :  { %v354_v57 = vpop.f32.mrf.mxu2 }
 0x134   :  { %396 = vrot.lane.b32.xlu2 %v198_v49, %s1893_s24  ;;  %384 = vrot.lane.b32.xlu1 %v376_v58, %s1896_s4 }
 0x13c   :  { %363 = vrot.lane.b32.xlu1 %v198_v49, %s1897_s22 }
 0x17e   :  { %v436_v59 = vpop.permute.xlu2 %435 }
 0x186   :  { %v430_v62 = vpop.permute.xlu2 %429 }
 0x187   :  { %v441_v63 = vsel %vm408_vm5, %v430_v62, %v436_v59 }
 0x188   :  { %v445_v0 = vmul.f32 %v441_v63, %v2067_v60 }
 0x18a   :  { %v447_v2 = vadd.f32 %v445_v0, %v443_v1 }
 0x18c   :  { %v453_v4 = vpack.c.bf16 %v447_v2, %v447_v2 }
 0x18e   :  { %v460_v5 = vsel %vm455_vm6, %v453_v4, 0  ;;  %v397_v12 = vpop.permute.xlu2 %396 }
 0x18f   :  { %469 = vmatpush.bf16.xpose.msra.mxu3 %v460_v5 }
 0x196   :  { %v368_v6 = vpop.permute.xlu1 %367 }
 0x197   :  { %485 = vmatpush.bf16.xpose.msrb.mxu3 %v460_v5  ;;  %v426_v7 = vsub.f32 0.0, %v368_v6  ;;  %v358_v8 = vpop.permute.xlu0 %357  ;;  %v444_v29 = vmul.f32 %v2072_v61, %v368_v6 }
 0x198   :  { %v377_v9 = vsub.f32 0.0, %v358_v8  ;;  %398 = vrot.lane.b32.xlu0 %v358_v8, %s1893_s24  ;;  %v414_v26 = vmul.f32 %v2072_v61, %v358_v8 }
 0x199   :  { %431 = vrot.lane.b32.xlu1 %v426_v7, %s1896_s4 }
 0x19a   :  { %386 = vrot.lane.b32.xlu2 %v377_v9, %s1896_s4 }
 0x19e   :  { %v361_v10 = vpop.permute.xlu1 %360 }
 0x19f   :  { %v378_v11 = vsub.f32 0.0, %v361_v10  ;;  %v415_v41 = vmul.f32 %v2072_v61, %v361_v10 }
 0x1a1   :  { %388 = vrot.lane.b32.xlu0 %v378_v11, %s1896_s4  ;;  %400 = vrot.lane.b32.xlu1 %v361_v10, %s1893_s24 }
 0x1a2   :  { %437 = vrot.lane.b32.xlu2 %v368_v6, %s1893_s24 }
 0x1a6   :  { %v385_v13 = vpop.permute.xlu1 %384 }
 0x1a7   :  { %v409_v14 = vsel %vm408_vm5, %v385_v13, %v397_v12 }
 0x1a8   :  { %v417_v15 = vmul.f32 %v409_v14, %v2067_v60 }
 0x1aa   :  { %v421_v17 = vadd.f32 %v417_v15, %v413_v16 }
 0x1ac   :  { %v449_v18 = vpack.c.bf16 %v421_v17, %v421_v17 }
 0x1ae   :  { %1396 = vmatmul.msk.bf16.vlgmr.msra.gmra.mxu3 %vm455_vm6, %v449_v18  ;;  %v364_v19 = vpop.permute.xlu1 %363 }
 0x1af   :  { %v379_v20 = vsub.f32 0.0, %v364_v19  ;;  %402 = vrot.lane.b32.xlu0 %v364_v19, %s1893_s24  ;;  %v416_v47 = vmul.f32 %v2072_v61, %v364_v19 }
 0x1b1   :  { %390 = vrot.lane.b32.xlu2 %v379_v20, %s1896_s4 }
 0x1f4   :  { %v387_v21 = vpop.permute.xlu2 %386 }
 0x1fc   :  { %v438_v23 = vpop.permute.xlu2 %437 }
 0x20a   :  { %v399_v22 = vpop.permute.xlu0 %398 }
 0x20b   :  { %v410_v24 = vsel %vm408_vm5, %v387_v21, %v399_v22  ;;  %v432_v25 = vpop.permute.xlu1 %431  ;;  %v391_v44 = vpop.permute.xlu2 %390 }
 0x20c   :  { %v418_v27 = vmul.f32 %v410_v24, %v2067_v60  ;;  %v442_v28 = vsel %vm408_vm5, %v432_v25, %v438_v23 }
 0x20d   :  { %v446_v30 = vmul.f32 %v442_v28, %v2067_v60 }
 0x20e   :  { %v422_v31 = vadd.f32 %v418_v27, %v414_v26 }
 0x20f   :  { %v448_v32 = vadd.f32 %v446_v30, %v444_v29 }
 0x210   :  { %v450_v33 = vpack.c.bf16 %v422_v31, %v422_v31 }
 0x211   :  { %v454_v35 = vpack.c.bf16 %v448_v32, %v448_v32 }
 0x212   :  { %1397 = vmatmul.msk.bf16.vlgmr.msrb.gmra.mxu3 %vm455_vm6, %v450_v33 }
 0x213   :  { %v389_v36 = vpop.permute.xlu0 %388  ;;  %v401_v37 = vpop.permute.xlu1 %400  ;;  %v495_v38 = vsel %vm455_vm6, %v454_v35, 0 }
 0x214   :  { %504 = vmatpush.bf16.xpose.msra.mxu3 %v495_v38  ;;  %520 = vmatpush.bf16.xpose.msrb.mxu0 %v495_v38  ;;  %v411_v39 = vsel %vm408_vm5, %v389_v36, %v401_v37 }
 0x215   :  { %v419_v40 = vmul.f32 %v411_v39, %v2067_v60  ;;  %v1659_v39 = vld [vmem:[#allocation5 + $0x8] sm:$0xff] }
 0x216   :  { %704 = vmatpush.bf16.msrb.mxu1 %v1659_v39  ;;  %v1546_v39 = vld [vmem:[#allocation7 + $0xc8] sm:$0xf] }
 0x217   :  { %v423_v42 = vadd.f32 %v419_v40, %v415_v41 }
 0x219   :  { %v451_v43 = vpack.c.bf16 %v423_v42, %v423_v42 }
 0x21c   :  { %606 = vmatpush.bf16.msrb.mxu3 %v2059_v56 }
 0x221   :  { %v403_v45 = vpop.permute.xlu0 %402 }
 0x222   :  { %v412_v46 = vsel %vm408_vm5, %v391_v44, %v403_v45  ;;  %1398 = vmatmul.msk.bf16.vlgmr.msra.gmra.mxu3 %vm455_vm6, %v451_v43  ;;  %v1658_v44 = vld [vmem:[#allocation5] sm:$0xff] }
 0x223   :  { %v420_v48 = vmul.f32 %v412_v46, %v2067_v60  ;;  %705 = vmatpush.bf16.msrb.mxu1 %v1658_v44  ;;  %v1548_v44 = vld [vmem:[#allocation7 + $0xd8] sm:$0xf0] }
 0x225   :  { %v424_v49 = vadd.f32 %v420_v48, %v416_v47  ;;  %v1661_v47 = vld [vmem:[#allocation5 + $0x18] sm:$0xff] }
 0x226   :  { %732 = vmatpush.bf16.msra.mxu2 %v1661_v47  ;;  %v1686_v47 = vld [vmem:[#allocation7 + $0xa4] sm:$0xf] }
 0x227   :  { %v452_v50 = vpack.c.bf16 %v424_v49, %v424_v49 }
 0x229   :  { %1399 = vmatmul.msk.bf16.vlgmr.msrb.gmra.mxu0 %vm455_vm6, %v452_v50 }
 0x231   :  { %v471_v55 = vpop.f32.mrf.mxu3 }
 0x232   :  { %v526_v56 = vmul.f32 0.17677669, %v471_v55 }
 0x234   :  { %v537_v57 = vsel %vm534_vm7, %v526_v56, -1e+30 }
 0x235   :  { %v542_v58 = vsel %vm541_vm8, %v537_v57, -inf }
 0x236   :  { %543 = vmax.xlane.f32.xlu1 %v542_v58  ;;  %v1660_v58 = vld [vmem:[#allocation5 + $0x10] sm:$0xff] }
 0x237   :  { %733 = vmatpush.bf16.msra.mxu2 %v1660_v58  ;;  %v1506_v58 = vld [vmem:[#allocation7 + $0x80] sm:$0xf] }
 0x239   :  { %v473_v59 = vpop.f32.mrf.mxu3 }
 0x23a   :  { %v1663_v59 = vld [vmem:[#allocation5 + $0x28] sm:$0xff] }
 0x295   :  { %v487_v61 = vpop.f32.mrf.mxu3 }
 0x296   :  { %v527_v62 = vmul.f32 0.17677669, %v487_v61  ;;  %v1665_v61 = vld [vmem:[#allocation5 + $0x38] sm:$0xff] }
 0x298   :  { %v538_v60 = vsel %vm534_vm7, %v527_v62, -1e+30  ;;  %v1664_v62 = vld [vmem:[#allocation5 + $0x30] sm:$0xff] }
 0x299   :  { %v545_v63 = vsel %vm541_vm8, %v538_v60, -inf }
 0x29a   :  { %546 = vmax.xlane.f32.xlu2 %v545_v63 }
 0x29d   :  { %v489_v0 = vpop.f32.mrf.mxu3 }
 0x2a5   :  { %v506_v1 = vpop.f32.mrf.mxu3 }
 0x2a6   :  { %v528_v2 = vmul.f32 0.17677669, %v506_v1  ;;  %v522_v4 = vpop.f32.mrf.mxu0 }
 0x2a7   :  { %v529_v5 = vmul.f32 0.17677669, %v522_v4 }
 0x2a8   :  { %v539_v6 = vsel %vm534_vm7, %v528_v2, -1e+30 }
 0x2a9   :  { %v548_v7 = vsel %vm541_vm8, %v539_v6, -inf  ;;  %v544_v8 = vpop.xlane.xlu1 %543  ;;  %v540_v9 = vsel %vm534_vm7, %v529_v5, -1e+30 }
 0x2aa   :  { %549 = vmax.xlane.f32.xlu0 %v548_v7  ;;  %v554_v10 = vsub.f32 %v537_v57, %v544_v8  ;;  %v551_v11 = vsel %vm541_vm8, %v540_v9, -inf }
 0x2ab   :  { %552 = vmax.xlane.f32.xlu2 %v551_v11  ;;  %v1554_v11 = vld [vmem:[#allocation7 + $0xe0] sm:$0xf] }
 0x2ac   :  { %v558_v12 = vmul.f32 1.442695, %v554_v10 }
 0x2ad   :  { %v508_v13 = vpop.f32.mrf.mxu3 }
 0x2ae   :  { %1733 = vpow2.f32 %v558_v12  ;;  %v524_v14 = vpop.f32.mrf.mxu0  ;;  %v1696_v12 = vld [vmem:[#allocation7 + $0xec] sm:$0xf0]  ;;  %v1694_v13 = vld [vmem:[#allocation7 + $0xe4] sm:$0xf] }
 0x2af   :  { %v1555_v14 = vor.u32 %v1696_v12, %v1554_v11  ;;  %v1492_v11 = vld [vmem:[#allocation7 + $0x70] sm:$0xf0]  ;;  %v1498_v12 = vld [vmem:[#allocation7 + $0x68] sm:$0xf] }
 0x2b1   :  { %1014 = vmatpush.bf16.msra.mxu1 %v1555_v14 }
 0x2b4   :  { %v1734_v15 = vpop.eup %1733 }
 0x2b5   :  { %v566_v16 = vsel %vm541_vm8, %v1734_v15, 0.0 }
 0x2b6   :  { %567 = vadd.xlane.f32.xlu1 %v566_v16  ;;  %v1562_v16 = vld [vmem:[#allocation7 + $0xe8] sm:$0xf] }
 0x2cf   :  { %371 = vrot.lane.b32.xlu1 %v2052_v51, %s1895_s8 }
 0x30d   :  { %v547_v17 = vpop.xlane.xlu2 %546 }
 0x30e   :  { %v555_v18 = vsub.f32 %v538_v60, %v547_v17  ;;  %v1662_v60 = vld [vmem:[#allocation5 + $0x20] sm:$0xff]  ;;  %v1697_v17 = vld [vmem:[#allocation7 + $0xf4] sm:$0xf0] }
 0x310   :  { %v560_v19 = vmul.f32 1.442695, %v555_v18 }
 0x312   :  { %1735 = vpow2.f32 %v560_v19  ;;  %v1563_v19 = vor.u32 %v1697_v17, %v1562_v16  ;;  %v1679_v16 = vld [vmem:[#allocation7 + $0x6c] sm:$0xf]  ;;  %v1500_v17 = vld [vmem:[#allocation7 + $0x78] sm:$0xf0] }
 0x318   :  { %v1736_v20 = vpop.eup %1735 }
 0x319   :  { %v569_v21 = vsel %vm541_vm8, %v1736_v20, 0.0 }
 0x31a   :  { %570 = vadd.xlane.f32.xlu0 %v569_v21  ;;  %v1564_v21 = vld [vmem:[#allocation7 + $0xf8] sm:$0xf0] }
 0x31d   :  { %v550_v22 = vpop.xlane.xlu0 %549 }
 0x31e   :  { %v556_v23 = vsub.f32 %v539_v6, %v550_v22  ;;  %v553_v24 = vpop.xlane.xlu2 %552 }
 0x31f   :  { %v557_v25 = vsub.f32 %v540_v9, %v553_v24 }
 0x320   :  { %v562_v26 = vmul.f32 1.442695, %v556_v23 }
 0x321   :  { %v564_v27 = vmul.f32 1.442695, %v557_v25 }
 0x322   :  { %1737 = vpow2.f32 %v562_v26 }
 0x323   :  { %1739 = vpow2.f32 %v564_v27 }
 0x328   :  { %v1738_v28 = vpop.eup %1737 }
 0x329   :  { %v1740_v29 = vpop.eup %1739  ;;  %v568_v30 = vpop.xlane.xlu1 %567  ;;  %v572_v51 = vsel %vm541_vm8, %v1738_v28, 0.0 }
 0x32a   :  { %1741 = vrcp.f32 %v568_v30  ;;  %573 = vadd.xlane.f32.xlu2 %v572_v51  ;;  %v575_v31 = vsel %vm541_vm8, %v1740_v29, 0.0 }
 0x32b   :  { %576 = vadd.xlane.f32.xlu0 %v575_v31 }
 0x330   :  { %v1742_v32 = vpop.eup %1741 }
 0x331   :  { %v582_v33 = vmul.f32 %v1742_v32, %v1734_v15  ;;  %v1556_v15 = vld [vmem:[#allocation7 + $0xf0] sm:$0xf0] }
 0x332   :  { %v1559_v18 = vor.u32 %v1694_v13, %v1556_v15  ;;  %v1681_v13 = vld [vmem:[#allocation7 + $0x74] sm:$0xf0] }
 0x333   :  { %v586_v35 = vpack.c.bf16 %v582_v33, %v582_v33  ;;  %v1538_v33 = vld [vmem:[#allocation7 + $0xc0] sm:$0xf]  ;;  %v1499_v15 = vor.u32 %v1681_v13, %v1498_v12  ;;  %v1701_v12 = vld [vmem:[%s2206_s11 + $0x18] sm:$0xff] }
 0x334   :  { %v1710_v13 = vld [vmem:[%s2206_s11 + $0x60] sm:$0xff] }
 0x335   :  { %1400 = vmatmul.msk.bf16.vlgmr.msrb.gmra.mxu3 %vm541_vm8, %v586_v35  ;;  %v1692_v35 = vld [vmem:[#allocation7 + $0xcc] sm:$0xf0] }
 0x341   :  { %v372_v36 = vpop.permute.xlu1 %371 }
 0x342   :  { %v591_v37 = vpack.c.bf16 %v372_v36, %v372_v36  ;;  %v1690_v36 = vld [vmem:[#allocation7 + $0xc4] sm:$0xf] }
 0x344   :  { %v632_v38 = vsel %vm595_vm4, %v591_v37, 0  ;;  %v1539_v37 = vor.u32 %v1692_v35, %v1538_v33  ;;  %v1670_v33 = vld [vmem:[#allocation7 + $0x24] sm:$0xf] }
 0x345   :  { %641 = vmatpush.bf16.msra.mxu3 %v632_v38  ;;  %657 = vmatpush.bf16.msra.mxu0 %v632_v38  ;;  %v1540_v38 = vld [vmem:[#allocation7 + $0xd0] sm:$0xf0] }
 0x346   :  { %1015 = vmatpush.bf16.msra.mxu1 %v1539_v37  ;;  %v1466_v37 = vld [vmem:[#allocation7 + $0x28] sm:$0xf] }
 0x349   :  { %760 = vmatpush.bf16.msrb.mxu3 %v1663_v59  ;;  %788 = vmatpush.bf16.msrb.mxu0 %v1665_v61  ;;  %v1684_v59 = vld [vmem:[#allocation7 + $0x8c] sm:$0xf0]  ;;  %v1682_v61 = vld [vmem:[#allocation7 + $0x84] sm:$0xf] }
 0x34d   :  { %789 = vmatpush.bf16.msrb.mxu0 %v1664_v62  ;;  %761 = vmatpush.bf16.msrb.mxu3 %v1662_v60  ;;  %v1507_v62 = vor.u32 %v1684_v59, %v1506_v58  ;;  %v1508_v60 = vld [vmem:[#allocation7 + $0x90] sm:$0xf0] }
 0x38d   :  { %v571_v40 = vpop.xlane.xlu0 %570 }
 0x38e   :  { %1743 = vrcp.f32 %v571_v40  ;;  %v1693_v40 = vld [vmem:[#allocation7 + $0xd4] sm:$0xf0] }
 0x394   :  { %v1744_v41 = vpop.eup %1743 }
 0x395   :  { %v583_v42 = vmul.f32 %v1744_v41, %v1736_v20  ;;  %v1695_v20 = vld [vmem:[#allocation7 + $0xec] sm:$0xf]  ;;  %v1543_v41 = vor.u32 %v1690_v36, %v1540_v38  ;;  %v1460_v36 = vld [vmem:[#allocation7 + $0x30] sm:$0xf0]  ;;  %v1673_v38 = vld [vmem:[#allocation7 + $0x34] sm:$0xf0] }
 0x396   :  { %v1567_v22 = vor.u32 %v1695_v20, %v1564_v21  ;;  %v1676_v20 = vld [vmem:[#allocation7 + $0x4c] sm:$0xf0]  ;;  %v1674_v21 = vld [vmem:[#allocation7 + $0x44] sm:$0xf] }
 0x397   :  { %v587_v43 = vpack.c.bf16 %v583_v42, %v583_v42  ;;  %v1547_v42 = vor.u32 %v1693_v40, %v1546_v39  ;;  %v1463_v39 = vor.u32 %v1670_v33, %v1460_v36  ;;  %v1467_v40 = vor.u32 %v1673_v38, %v1466_v37 }
 0x399   :  { %1401 = vmatmul.msk.bf16.vlgmr.msrb.gmra.mxu2 %vm541_vm8, %v587_v43  ;;  %v1691_v43 = vld [vmem:[#allocation7 + $0xcc] sm:$0xf] }
 0x39a   :  { %1027 = vmatpush.bf16.msrb.mxu2 %v1559_v18  ;;  %v1503_v18 = vor.u32 %v1679_v16, %v1500_v17  ;;  %v1699_v16 = vld [vmem:[%s2206_s11 + $0x8] sm:$0xff]  ;;  %v1708_v17 = vld [vmem:[%s2206_s11 + $0x50] sm:$0xff] }
 0x39d   :  { %v574_v45 = vpop.xlane.xlu2 %573 }
 0x39e   :  { %1745 = vrcp.f32 %v574_v45  ;;  %v577_v46 = vpop.xlane.xlu0 %576  ;;  %1028 = vmatpush.bf16.msrb.mxu2 %v1543_v41  ;;  %v1522_v45 = vld [vmem:[#allocation7 + $0xa0] sm:$0xf]  ;;  %v1671_v41 = vld [vmem:[#allocation7 + $0x2c] sm:$0xf] }
 0x39f   :  { %1747 = vrcp.f32 %v577_v46  ;;  %v1688_v46 = vld [vmem:[#allocation7 + $0xac] sm:$0xf0] }
 0x3a4   :  { %v1746_v48 = vpop.eup %1745 }
 0x3a5   :  { %v1748_v49 = vpop.eup %1747  ;;  %v584_v50 = vmul.f32 %v1746_v48, %v1738_v28  ;;  %v1523_v48 = vor.u32 %v1688_v46, %v1522_v45  ;;  %v1666_v45 = vld [vmem:[#allocation7 + $0x4] sm:$0xf] }
 0x3a6   :  { %v585_v52 = vmul.f32 %v1748_v49, %v1740_v29  ;;  %v1524_v49 = vld [vmem:[#allocation7 + $0xb0] sm:$0xf0] }
 0x3a7   :  { %v588_v53 = vpack.c.bf16 %v584_v50, %v584_v50  ;;  %v1530_v50 = vld [vmem:[#allocation7 + $0xa8] sm:$0xf]  ;;  %1016 = vmatpush.bf16.msra.mxu1 %v1523_v48 }
 0x3a8   :  { %v589_v54 = vpack.c.bf16 %v585_v52, %v585_v52  ;;  %v1689_v52 = vld [vmem:[#allocation7 + $0xb4] sm:$0xf0]  ;;  %v1450_v48 = vld [vmem:[#allocation7 + $0x8] sm:$0xf] }
 0x3a9   :  { %1402 = vmatmul.msk.bf16.vlgmr.msra.gmra.mxu3 %vm541_vm8, %v588_v53  ;;  %v1527_v53 = vor.u32 %v1686_v47, %v1524_v49  ;;  %v1444_v47 = vld [vmem:[#allocation7 + $0x10] sm:$0xf0]  ;;  %v1669_v49 = vld [vmem:[#allocation7 + $0x14] sm:$0xf0] }
 0x3aa   :  { %1403 = vmatmul.msk.bf16.vlgmr.msra.gmra.mxu0 %vm541_vm8, %v589_v54  ;;  %1040 = vmatpush.bf16.msra.mxu3 %v1563_v19  ;;  %v1531_v54 = vor.u32 %v1689_v52, %v1530_v50  ;;  %v1474_v19 = vld [vmem:[#allocation7 + $0x40] sm:$0xf]  ;;  %v1447_v50 = vor.u32 %v1666_v45, %v1444_v47  ;;  %v1451_v52 = vor.u32 %v1669_v49, %v1450_v48 }
 0x3ab   :  { %1053 = vmatpush.bf16.msra.mxu0 %v1567_v22  ;;  %1029 = vmatpush.bf16.msrb.mxu2 %v1527_v53  ;;  %v1475_v22 = vor.u32 %v1676_v20, %v1474_v19  ;;  %v1667_v53 = vld [vmem:[#allocation7 + $0xc] sm:$0xf] }
 0x3ac   :  { %1017 = vmatpush.bf16.msra.mxu1 %v1507_v62 }
 0x3ae   :  { %1041 = vmatpush.bf16.msra.mxu3 %v1547_v42  ;;  %v1468_v42 = vld [vmem:[#allocation7 + $0x38] sm:$0xf0] }
 0x3b2   :  { %1042 = vmatpush.bf16.msra.mxu3 %v1531_v54  ;;  %v1452_v54 = vld [vmem:[#allocation7 + $0x18] sm:$0xf0] }
 0x3b8   :  { %v608_v55 = vpop.f32.mrf.mxu3 }
 0x3b9   :  { %v663_v56 = vpack.c.bf16 %v608_v55, %v608_v55  ;;  %v1687_v55 = vld [vmem:[#allocation7 + $0xac] sm:$0xf] }
 0x3bb   :  { %1412 = vmatmul.msk.bf16.vlgmr.msrb.gmra.mxu1 %vm455_vm6, %v663_v56  ;;  %v1532_v56 = vld [vmem:[#allocation7 + $0xb8] sm:$0xf0] }
 0x3c0   :  { %v610_v57 = vpop.f32.mrf.mxu3 }
 0x3c1   :  { %v1535_v57 = vor.u32 %v1687_v55, %v1532_v56  ;;  %v1455_v55 = vor.u32 %v1667_v53, %v1452_v54 }
 0x41c   :  { %v624_v63 = vpop.f32.mrf.mxu2 }
 0x41d   :  { %v664_v0 = vpack.c.bf16 %v624_v63, %v624_v63  ;;  %v1514_v63 = vld [vmem:[#allocation7 + $0x88] sm:$0xf] }
 0x41f   :  { %1421 = vmatmul.msk.bf16.vlgmr.msra.gmra.mxu2 %vm455_vm6, %v664_v0  ;;  %v1685_v0 = vld [vmem:[#allocation7 + $0x94] sm:$0xf0] }
 0x424   :  { %v626_v1 = vpop.f32.mrf.mxu2 }
 0x425   :  { %v1511_v1 = vor.u32 %v1682_v61, %v1508_v60 }
 0x427   :  { %v659_v2 = vpop.f32.mrf.mxu0  ;;  %1030 = vmatpush.bf16.msrb.mxu2 %v1511_v1  ;;  %v1728_v1 = vld [vmem:[%s2204_s9] ss:$0 sm:$0xff] }
 0x428   :  { %v666_v4 = vpack.c.bf16 %v659_v2, %v659_v2  ;;  %v1515_v2 = vor.u32 %v1685_v0, %v1514_v63 }
 0x42a   :  { %1439 = vmatmul.msk.bf16.vlgmr.msrb.gmra.mxu0 %vm455_vm6, %v666_v4  ;;  %v1683_v4 = vld [vmem:[#allocation7 + $0x8c] sm:$0xf]  ;;  %1043 = vmatpush.bf16.msra.mxu3 %v1515_v2 }
 0x42c   :  { %v643_v5 = vpop.f32.mrf.mxu3 }
 0x42d   :  { %v665_v6 = vpack.c.bf16 %v643_v5, %v643_v5  ;;  %v1516_v5 = vld [vmem:[#allocation7 + $0x98] sm:$0xf0] }
 0x42e   :  { %1044 = vmatpush.bf16.msra.mxu3 %v1499_v15  ;;  %v1709_v15 = vld [vmem:[%s2206_s11 + $0x58] sm:$0xff] }
 0x42f   :  { %1430 = vmatmul.msk.bf16.vlgmr.msrb.gmra.mxu3 %vm455_vm6, %v665_v6  ;;  %v661_v7 = vpop.f32.mrf.mxu0  ;;  %v1519_v6 = vor.u32 %v1683_v4, %v1516_v5 }
 0x430   :  { %v1490_v7 = vld [vmem:[#allocation7 + $0x60] sm:$0xf] }
 0x434   :  { %v645_v8 = vpop.f32.mrf.mxu3 }
 0x435   :  { %v1680_v8 = vld [vmem:[#allocation7 + $0x6c] sm:$0xf0] }
 0x438   :  { %v707_v9 = vpop.f32.mrf.mxu1 }
 0x440   :  { %v709_v10 = vpop.f32.mrf.mxu1 }
 0x441   :  { %v1491_v10 = vor.u32 %v1680_v8, %v1490_v7  ;;  %v1704_v7 = vld [vmem:[%s2206_s11 + $0x30] sm:$0xff]  ;;  %v1703_v8 = vld [vmem:[%s2206_s11 + $0x28] sm:$0xff] }
 0x443   :  { %1018 = vmatpush.bf16.msra.mxu1 %v1491_v10  ;;  %v1702_v10 = vld [vmem:[%s2206_s11 + $0x20] sm:$0xff] }
 0x447   :  { %1019 = vmatpush.bf16.msra.mxu1 %v1475_v22  ;;  %v1707_v22 = vld [vmem:[%s2206_s11 + $0x48] sm:$0xff] }
 0x4a2   :  { %v735_v23 = vpop.f32.mrf.mxu2 }
 0x4a3   :  { %v795_v27 = vadd.f32 %v735_v23, %v707_v9  ;;  %v1678_v9 = vld [vmem:[#allocation7 + $0x64] sm:$0xf]  ;;  %v1476_v23 = vld [vmem:[#allocation7 + $0x50] sm:$0xf0] }
 0x4a4   :  { %v1495_v14 = vor.u32 %v1678_v9, %v1492_v11  ;;  %v1712_v9 = vld [vmem:[%s2206_s11 + $0x70] sm:$0xff]  ;;  %v1711_v11 = vld [vmem:[%s2206_s11 + $0x68] sm:$0xff] }
 0x4a6   :  { %1031 = vmatpush.bf16.msrb.mxu2 %v1495_v14  ;;  %v1700_v14 = vld [vmem:[%s2206_s11 + $0x10] sm:$0xff] }
 0x4a7   :  { %v791_v24 = vpop.f32.mrf.mxu0 }
 0x4aa   :  { %v737_v25 = vpop.f32.mrf.mxu2 }
 0x4ab   :  { %v1677_v25 = vld [vmem:[#allocation7 + $0x54] sm:$0xf0] }
 0x4af   :  { %v793_v26 = vpop.f32.mrf.mxu0 }
 0x4b0   :  { %v1479_v26 = vor.u32 %v1674_v21, %v1476_v23  ;;  %v1706_v23 = vld [vmem:[%s2206_s11 + $0x40] sm:$0xff] }
 0x4b2   :  { %v763_v28 = vpop.f32.mrf.mxu3  ;;  %1032 = vmatpush.bf16.msrb.mxu2 %v1479_v26 }
 0x4b3   :  { %v796_v29 = vadd.f32 %v795_v27, %v763_v28  ;;  %v1675_v28 = vld [vmem:[#allocation7 + $0x4c] sm:$0xf] }
 0x4b5   :  { %v797_v30 = vadd.f32 %v796_v29, %v791_v24  ;;  %v1482_v24 = vld [vmem:[#allocation7 + $0x48] sm:$0xf]  ;;  %v1484_v29 = vld [vmem:[#allocation7 + $0x58] sm:$0xf0] }
 0x4b6   :  { %v1483_v27 = vor.u32 %v1677_v25, %v1482_v24  ;;  %1033 = vmatpush.bf16.msrb.mxu2 %v1463_v39 }
 0x4b7   :  { %v2131_v51 = vadd.f32 %v797_v30, %v1990_v3  ;;  %v1551_v3 = vor.u32 %v1691_v43, %v1548_v44  ;;  %v1487_v30 = vor.u32 %v1675_v28, %v1484_v29  ;;  %v1471_v43 = vor.u32 %v1671_v41, %v1468_v42  ;;  %v1442_v44 = vld [vmem:[#allocation7] sm:$0xf] }
 0x4b8   :  { %1045 = vmatpush.bf16.msra.mxu3 %v1483_v27 }
 0x4b9   :  { %799 = vst [vmem:[#allocation9] sm:$0xff] %v2131_v51  ;;  %v800_v31 = vmul.f32 %v2131_v51, %v2131_v51  ;;  %1054 = vmatpush.bf16.msra.mxu0 %v1551_v3  ;;  %v1668_v3 = vld [vmem:[#allocation7 + $0xc] sm:$0xf0] }
 0x4ba   :  { %v765_v32 = vpop.f32.mrf.mxu3  ;;  %v1443_v46 = vor.u32 %v1668_v3, %v1442_v44  ;;  %1034 = vmatpush.bf16.msrb.mxu2 %v1447_v50 }
 0x4bb   :  { %801 = vadd.xlane.f32.xlu2 %v800_v31  ;;  %v1458_v31 = vld [vmem:[#allocation7 + $0x20] sm:$0xf]  ;;  %v1672_v32 = vld [vmem:[#allocation7 + $0x2c] sm:$0xf0] }
 0x4bc   :  { %v1459_v35 = vor.u32 %v1672_v32, %v1458_v31  ;;  %1046 = vmatpush.bf16.msra.mxu3 %v1467_v40 }
 0x4bd   :  { %1055 = vmatpush.bf16.msra.mxu0 %v1535_v57 }
 0x4be   :  { %1020 = vmatpush.bf16.msra.mxu1 %v1459_v35 }
 0x4c0   :  { %1047 = vmatpush.bf16.msra.mxu3 %v1451_v52 }
 0x4c1   :  { %1056 = vmatpush.bf16.msra.mxu0 %v1519_v6  ;;  %v1705_v6 = vld [vmem:[%s2206_s11 + $0x38] sm:$0xff] }
 0x4c2   :  { %1021 = vmatpush.bf16.msra.mxu1 %v1443_v46 }
 0x4c5   :  { %1057 = vmatpush.bf16.msra.mxu0 %v1503_v18  ;;  %v1698_v18 = vld [vmem:[%s2206_s11] sm:$0xff] }
 0x4c6   :  { %1238 = vmatpush.bf16.msrb.mxu1 %v1705_v6 }
 0x4c9   :  { %1058 = vmatpush.bf16.msra.mxu0 %v1487_v30 }
 0x4ca   :  { %1239 = vmatpush.bf16.msrb.mxu1 %v1704_v7 }
 0x4cd   :  { %1059 = vmatpush.bf16.msra.mxu0 %v1471_v43 }
 0x4ce   :  { %1240 = vmatpush.bf16.msrb.mxu1 %v1703_v8 }
 0x4d1   :  { %1060 = vmatpush.bf16.msra.mxu0 %v1455_v55 }
 0x4d2   :  { %1241 = vmatpush.bf16.msrb.mxu1 %v1702_v10 }
 0x4d6   :  { %1242 = vmatpush.bf16.msrb.mxu1 %v1701_v12 }
 0x4da   :  { %1243 = vmatpush.bf16.msrb.mxu1 %v1700_v14 }
 0x4de   :  { %1244 = vmatpush.bf16.msrb.mxu1 %v1699_v16 }
 0x4e2   :  { %1245 = vmatpush.bf16.msrb.mxu1 %v1698_v18 }
 0x52e   :  { %v802_v56 = vpop.xlane.xlu2 %801 }
 0x52f   :  { %v803_v57 = vmul.f32 %v802_v56, %v2042_v34 }
 0x531   :  { %v804_v58 = vadd.f32 1e-06, %v803_v57 }
 0x533   :  { %1749 = vrsqrt.f32 %v804_v58  ;;  %vm811_vm10 = vweird.f32 %v804_v58 }
 0x539   :  { %v1750_v59 = vpop.eup %1749 }
 0x53a   :  { %v806_v61 = vmul.f32 %v1750_v59, %v804_v58  ;;  %vm812_vm9 = vweird.f32 %v1750_v59 }
 0x53b   :  { %vm813_vm11 = vmor %vm811_vm10, %vm812_vm9 }
 0x53c   :  { %v807_v62 = vmul.f32 %v1750_v59, %v806_v61 }
 0x53e   :  { %v808_v60 = vmul.f32 0.5, %v807_v62 }
 0x540   :  { %v809_v63 = vsub.f32 1.5, %v808_v60 }
 0x542   :  { %v810_v0 = vmul.f32 %v1750_v59, %v809_v63 }
 0x544   :  { %v814_v2 = vsel %vm813_vm11, %v1750_v59, %v810_v0 }
 0x545   :  { %v815_v4 = vmul.f32 %v814_v2, %v2131_v51  ;;  %v1713_v51 = vld [vmem:[%s2206_s11 + $0x78] sm:$0xff]  ;;  %s1898_s11 = smov [#allocation9]  }
 0x546   :  { %1251 = vmatpush.bf16.msra.mxu2 %v1713_v51  ;;  %s1282_s9 = sshll.u32 %s1898_s11, 4  ;;  %s1283_s9 = int_to_ptr.vmem [resolvable:$true] %s1282_s9 }
 0x547   :  { %v820_v5 = vmul.f32 %v1728_v1, %v815_v4  ;;  %1287 = dma.vmem_to_hbm [thread:$0]  %s1283_s9, 128, %s1285_s30, [#allocation10]  }
 0x549   :  { %v821_v34 = vpack.c.bf16 %v820_v5, %v820_v5 }
 0x54a   :  { %1252 = vmatpush.bf16.msra.mxu2 %v1712_v9 }
 0x54b   :  { %1022 = vmatmul.bf16.vlgmr.msra.gmra.mxu1 %v821_v34  ;;  %1035 = vmatmul.bf16.vlgmr.msrb.gmra.mxu2 %v821_v34 }
 0x54c   :  { %1048 = vmatmul.bf16.vlgmr.msra.gmra.mxu3 %v821_v34  ;;  %1061 = vmatmul.bf16.vlgmr.msra.gmra.mxu0 %v821_v34 }
 0x54e   :  { %1253 = vmatpush.bf16.msra.mxu2 %v1711_v11 }
 0x552   :  { %1254 = vmatpush.bf16.msra.mxu2 %v1710_v13 }
 0x556   :  { %1255 = vmatpush.bf16.msra.mxu2 %v1709_v15 }
 0x55a   :  { %1256 = vmatpush.bf16.msra.mxu2 %v1708_v17 }
 0x55e   :  { %1257 = vmatpush.bf16.msra.mxu2 %v1707_v22 }
 0x562   :  { %1258 = vmatpush.bf16.msra.mxu2 %v1706_v23 }
 0x5c8   :  { %v1023_v19 = vpop.f32.mrf.mxu1 }
 0x5c9   :  { %v1568_v20 = vmul.f32 -1.442695, %v1023_v19  ;;  %v1062_v21 = vpop.f32.mrf.mxu0 }
 0x5cb   :  { %1751 = vpow2.f32 %v1568_v20 }
 0x5ce   :  { %v1036_v24 = vpop.f32.mrf.mxu2 }
 0x5cf   :  { %v1569_v25 = vmul.f32 -1.442695, %v1036_v24  ;;  %v1049_v26 = vpop.f32.mrf.mxu3 }
 0x5d0   :  { %v1025_v27 = vpop.f32.mrf.mxu1 }
 0x5d1   :  { %v1752_v28 = vpop.eup %1751  ;;  %1753 = vpow2.f32 %v1569_v25  ;;  %v1064_v29 = vpop.f32.mrf.mxu0 }
 0x5d2   :  { %v1072_v30 = vadd.f32 1.0, %v1752_v28 }
 0x5d4   :  { %1755 = vrcp.f32 %v1072_v30  ;;  %v1085_v39 = vand.u32 2147483648, %v1072_v30  ;;  %v1083_v41 = vand.u32 2147483647, %v1072_v30  ;;  %vm1079_vm13 = vweird.f32 %v1072_v30 }
 0x5d6   :  { %v1038_v31 = vpop.f32.mrf.mxu2  ;;  %v1086_v3 = vor.u32 1.1754944e-38, %v1085_v39  ;;  %vm1084_vm15 = vcmp.eq.f32.partialorder %v1083_v41, 8.507059e+37 }
 0x5d7   :  { %v1754_v32 = vpop.eup %1753  ;;  %v1051_v33 = vpop.f32.mrf.mxu3 }
 0x5d8   :  { %v1073_v35 = vadd.f32 1.0, %v1754_v32 }
 0x5da   :  { %v1756_v36 = vpop.eup %1755  ;;  %1757 = vrcp.f32 %v1073_v35  ;;  %v1100_v48 = vand.u32 2147483648, %v1073_v35  ;;  %v1098_v52 = vand.u32 2147483647, %v1073_v35  ;;  %vm1094_vm1 = vweird.f32 %v1073_v35 }
 0x5db   :  { %v1075_v37 = vmul.f32 %v1756_v36, %v1072_v30  ;;  %vm1080_vm12 = vweird.f32 %v1756_v36 }
 0x5dc   :  { %vm1081_vm14 = vmor %vm1079_vm13, %vm1080_vm12  ;;  %v1101_v55 = vor.u32 1.1754944e-38, %v1100_v48  ;;  %vm1099_vm3 = vcmp.eq.f32.partialorder %v1098_v52, 8.507059e+37 }
 0x5dd   :  { %v1076_v38 = vsub.f32 1.0, %v1075_v37 }
 0x5df   :  { %v1077_v40 = vmul.f32 %v1756_v36, %v1076_v38 }
 0x5e0   :  { %v1758_v42 = vpop.eup %1757 }
 0x5e1   :  { %v1078_v43 = vadd.f32 %v1756_v36, %v1077_v40  ;;  %v1090_v44 = vmul.f32 %v1758_v42, %v1073_v35  ;;  %vm1095_vm0 = vweird.f32 %v1758_v42 }
 0x5e2   :  { %vm1096_vm2 = vmor %vm1094_vm1, %vm1095_vm0 }
 0x5e3   :  { %v1082_v45 = vsel %vm1081_vm14, %v1756_v36, %v1078_v43  ;;  %v1091_v46 = vsub.f32 1.0, %v1090_v44 }
 0x5e4   :  { %v1087_v47 = vsel %vm1084_vm15, %v1086_v3, %v1082_v45 }
 0x5e5   :  { %v1104_v49 = vmul.f32 %v1087_v47, %v1023_v19  ;;  %v1092_v50 = vmul.f32 %v1758_v42, %v1091_v46 }
 0x5e7   :  { %v1093_v53 = vadd.f32 %v1758_v42, %v1092_v50  ;;  %v1106_v54 = vmul.f32 %v1104_v49, %v1049_v26 }
 0x5e9   :  { %v1097_v56 = vsel %vm1096_vm2, %v1758_v42, %v1093_v53  ;;  %v1108_v57 = vpack.c.bf16 %v1106_v54, %v1106_v54 }
 0x5ea   :  { %v1102_v58 = vsel %vm1099_vm3, %v1101_v55, %v1097_v56 }
 0x5eb   :  { %v1105_v59 = vmul.f32 %v1102_v58, %v1036_v24  ;;  %1246 = vmatmul.bf16.vlgmr.msrb.gmra.mxu1 %v1108_v57 }
 0x5ed   :  { %v1107_v61 = vmul.f32 %v1105_v59, %v1062_v21 }
 0x5ef   :  { %v1109_v62 = vpack.c.bf16 %v1107_v61, %v1107_v61 }
 0x5f1   :  { %1259 = vmatmul.bf16.vlgmr.msra.gmra.mxu2 %v1109_v62 }
 0x668   :  { %v1247_v60 = vpop.f32.mrf.mxu1 }
 0x670   :  { %v1249_v63 = vpop.f32.mrf.mxu1 }
 0x674   :  { %v1260_v0 = vpop.f32.mrf.mxu2 }
 0x675   :  { %v1261_v1 = vadd.f32 %v1260_v0, %v1247_v60 }
 0x677   :  { %v1264_v2 = vpack.c.bf16 %v1261_v1, %v1261_v1 }
 0x679   :  { %1265 = vst [vmem:[#allocation8] sm:$0xf] %v1264_v2 }
 0x67a   :  { %1276 = dma.vmem_to_hbm [thread:$0]  %s1272_s0, 64, %s1274_s17, [#allocation4]  }
 0x67c   :  { %v1262_v4 = vpop.f32.mrf.mxu2 }
 0x67d   :  { %1883 = dma.done.wait [#allocation4], 64  }
 0x67e   :  { %1884 = vsyncadd [#allocation4], 4294967232 }
 0x67f   :  { %1885 = dma.done.wait [#allocation10], 128  }
 0x680   :  { %1886 = vsyncadd [#allocation10], 4294967168 }
 0x681   :  { %1296 = vsyncpa [#allocation3], 1 }
 0x682   :  { %1297 = vsyncpa [#allocation6], 1 }
 0x683   :  { %1298 = vsyncpa [#allocation4], 1 }
 0x684   :  { %1299 = vsyncpa [#allocation10], 1 }

</bundles_post_ra>
